<compile_context>
chip_gen: v5e
topology: v5e:2x2
jax: 0.10.0
libtpu: 0.0.40
codegen_flags: <defaults>
</compile_context>

<pallas_src>
import functools

import jax
import jax.numpy as jnp
from jax.experimental import pallas as pl
from jax.experimental.pallas import tpu as pltpu


# ----------------------------------------------------------------------------
# Fused kernel
# ----------------------------------------------------------------------------
def fused_lstm_fc_kernel(*refs):
    """Fused num_layers LSTM cells (single timestep, zero state) + fc linear.

    Ref layout:
      refs[0]            x_ref        (B, D_in)
      refs[1 + 2*l]      w_gates_ref  (3, D_l, H)  stacked i/g/o weights (transposed)
      refs[2 + 2*l]      b_gates_ref  (3, 1, H)    stacked fused i/g/o biases (b_ih+b_hh)
      refs[-3]           wf_t_ref     (H, H)       fc weight (transposed)
      refs[-2]           bf_ref       (1, H)       fc bias
      refs[-1]           out_ref      (B, H)
    """
    x_ref, out_ref = refs[0], refs[-1]
    wf_t_ref, bf_ref = refs[-3], refs[-2]
    layer_refs = refs[1:-3]
    num_layers = len(layer_refs) // 2

    h = x_ref[...].astype(jnp.float32)
    for layer in range(num_layers):  # static unroll over layers
        w = layer_refs[2 * layer]
        b = layer_refs[2 * layer + 1]
        # Each gate matmul works on a whole (D_in, H) tile -> no sub-vreg slicing.
        i_g = jax.nn.sigmoid(
            jnp.dot(h, w[0], preferred_element_type=jnp.float32) + b[0]
        )
        g_g = jnp.tanh(
            jnp.dot(h, w[1], preferred_element_type=jnp.float32) + b[1]
        )
        o_g = jax.nn.sigmoid(
            jnp.dot(h, w[2], preferred_element_type=jnp.float32) + b[2]
        )
        # c_prev = 0  =>  c = sigmoid(i) * tanh(g);   h = sigmoid(o) * tanh(c)
        h = o_g * jnp.tanh(i_g * g_g)

    out_ref[...] = (
        jnp.dot(h, wf_t_ref[...], preferred_element_type=jnp.float32) + bf_ref[...]
    ).astype(out_ref.dtype)


# ----------------------------------------------------------------------------
# One-time parameter preparation (hoisted out of the forward pass)
# ----------------------------------------------------------------------------
def prepare_params(params):
    """Re-layout PyTorch-style params into kernel-ready tensors (runs once)."""
    prepped = {"layers": [], "fc": {}}
    for p in params["lstm"]:
        w_ih = p["w_ih"].astype(jnp.float32)                    # (4H, D_in)
        H = w_ih.shape[0] // 4
        bias = p["b_ih"].astype(jnp.float32) + p["b_hh"].astype(jnp.float32)  # (4H,)
        # PyTorch gate order is (i, f, g, o); the f gate is dead (c_prev = 0).
        keep = (0, 2, 3)                                        # i, g, o
        w_gates = jnp.stack(
            [jnp.transpose(w_ih[k * H:(k + 1) * H, :]) for k in keep], axis=0
        )                                                        # (3, D_in, H)
        b_gates = jnp.stack(
            [bias[k * H:(k + 1) * H][None, :] for k in keep], axis=0
        )                                                        # (3, 1, H)
        prepped["layers"].append((w_gates, b_gates))
    prepped["fc"] = {
        "w_t": jnp.transpose(params["fc"]["w"].astype(jnp.float32)),  # (H, H)
        "b": params["fc"]["b"].astype(jnp.float32)[None, :],          # (1, H)
    }
    return prepped


# ----------------------------------------------------------------------------
# Forward wrapper (single pallas_call)
# ----------------------------------------------------------------------------
def _full_spec(shape):
    return pl.BlockSpec(shape, lambda: tuple(0 for _ in shape))


@jax.jit
def lstm_encoder_forward(prepped, x):
    """Forward of LSTMEncoder (eval mode). x: (B, input_dim) -> (B, hidden_dim)."""
    batch = x.shape[0]
    hidden_dim = prepped["fc"]["w_t"].shape[1]

    operands = [x]
    for w_gates, b_gates in prepped["layers"]:
        operands.append(w_gates)
        operands.append(b_gates)
    operands.append(prepped["fc"]["w_t"])
    operands.append(prepped["fc"]["b"])

    return pl.pallas_call(
        fused_lstm_fc_kernel,
        out_shape=jax.ShapeDtypeStruct((batch, hidden_dim), x.dtype),
        grid=(),
        in_specs=[_full_spec(op.shape) for op in operands],
        out_specs=_full_spec((batch, hidden_dim)),
    )(*operands)


# ----------------------------------------------------------------------------
# Parameter init (PyTorch-like uniform ranges) + pure-JAX reference
# ----------------------------------------------------------------------------
def init_params(key, input_dim, hidden_dim, num_layers, dtype=jnp.float32):
    params = {"lstm": [], "fc": {}}
    k = 1.0 / jnp.sqrt(hidden_dim)
    for layer in range(num_layers):
        d_in = input_dim if layer == 0 else hidden_dim
        key, k1, k2, k3, k4 = jax.random.split(key, 5)
        params["lstm"].append(
            {
                "w_ih": jax.random.uniform(k1, (4 * hidden_dim, d_in), dtype, -k, k),
                "w_hh": jax.random.uniform(k2, (4 * hidden_dim, hidden_dim), dtype, -k, k),
                "b_ih": jax.random.uniform(k3, (4 * hidden_dim,), dtype, -k, k),
                "b_hh": jax.random.uniform(k4, (4 * hidden_dim,), dtype, -k, k),
            }
        )
    key, k1, k2 = jax.random.split(key, 3)
    params["fc"] = {
        "w": jax.random.uniform(k1, (hidden_dim, hidden_dim), dtype, -k, k),
        "b": jax.random.uniform(k2, (hidden_dim,), dtype, -k, k),
    }
    return params


def reference_forward(params, x):
    """Pure-JAX reference with full 4-gate LSTM math (zero initial state)."""
    h = x
    for p in params["lstm"]:
        gates = h @ p["w_ih"].T + p["b_ih"] + p["b_hh"]
        i, f, g, o = jnp.split(gates, 4, axis=-1)
        c = jax.nn.sigmoid(i) * jnp.tanh(g)          # + sigmoid(f) * c_prev(=0)
        h = jax.nn.sigmoid(o) * jnp.tanh(c)
    return h @ params["fc"]["w"].T + params["fc"]["b"]


if __name__ == "__main__":
    batch, input_dim, hidden_dim, num_layers = 4, 16, 32, 2

    key = jax.random.PRNGKey(0)
    key, pkey, xkey = jax.random.split(key, 3)
    params = init_params(pkey, input_dim, hidden_dim, num_layers)
    x = jax.random.normal(xkey, (batch, input_dim), jnp.float32)

    prepped = prepare_params(params)              # one-time re-layout
    out = lstm_encoder_forward(prepped, x)
    out = jax.block_until_ready(out)

    ref = reference_forward(params, x)
    assert out.shape == (batch, hidden_dim)
    assert jnp.allclose(out, ref, atol=1e-5, rtol=1e-5), "mismatch vs reference"

    print("KERNEL_OK")
</pallas_src>

<mosaic_0001>
module attributes {stable_mosaic.version = 11 : i64} {
  func.func @fused_lstm_fc_kernel(%arg0: memref<4x16xf32, #tpu.memory_space<vmem>>, %arg1: memref<3x16x32xf32, #tpu.memory_space<vmem>>, %arg2: memref<3x1x32xf32, #tpu.memory_space<vmem>>, %arg3: memref<3x32x32xf32, #tpu.memory_space<vmem>>, %arg4: memref<3x1x32xf32, #tpu.memory_space<vmem>>, %arg5: memref<32x32xf32, #tpu.memory_space<vmem>>, %arg6: memref<1x32xf32, #tpu.memory_space<vmem>>, %arg7: memref<4x32xf32, #tpu.memory_space<vmem>>) attributes {dimension_semantics = [], scalar_prefetch = 0 : i64, scratch_operands = 0 : i64, tpu.core_type = #tpu.core_type<tc>} {
    %c0 = arith.constant 0 : index
    %c0_0 = arith.constant 0 : index
    %0 = vector.load %arg0[%c0, %c0_0] : memref<4x16xf32, #tpu.memory_space<vmem>>, vector<4x16xf32>
    %c0_1 = arith.constant 0 : index
    %c0_2 = arith.constant 0 : index
    %c0_3 = arith.constant 0 : index
    %1 = vector.load %arg1[%c0_1, %c0_2, %c0_3] : memref<3x16x32xf32, #tpu.memory_space<vmem>>, vector<1x16x32xf32>
    %2 = vector.shape_cast %1 : vector<1x16x32xf32> to vector<16x32xf32>
    %cst = arith.constant dense<0.000000e+00> : vector<4x32xf32>
    %3 = tpu.matmul %0, %2, %cst {dimension_numbers = #tpu.dot_dimension_numbers<[1], [0], [0], [1], [0, 0, 1, 1], [], []>} : vector<4x16xf32>, vector<16x32xf32>, vector<4x32xf32> -> vector<4x32xf32>
    %c0_4 = arith.constant 0 : index
    %c0_5 = arith.constant 0 : index
    %c0_6 = arith.constant 0 : index
    %4 = vector.load %arg2[%c0_4, %c0_5, %c0_6] : memref<3x1x32xf32, #tpu.memory_space<vmem>>, vector<1x1x32xf32>
    %5 = vector.shape_cast %4 : vector<1x1x32xf32> to vector<1x32xf32>
    %6 = vector.broadcast %5 : vector<1x32xf32> to vector<4x32xf32>
    %7 = arith.addf %3, %6 : vector<4x32xf32>
    %8 = arith.negf %7 : vector<4x32xf32>
    %9 = math.exp %8 : vector<4x32xf32>
    %cst_7 = arith.constant 1.000000e+00 : f32
    %10 = vector.broadcast %cst_7 : f32 to vector<4x32xf32>
    %11 = arith.addf %10, %9 : vector<4x32xf32>
    %12 = arith.divf %10, %11 : vector<4x32xf32>
    %c1 = arith.constant 1 : index
    %c0_8 = arith.constant 0 : index
    %c0_9 = arith.constant 0 : index
    %13 = vector.load %arg1[%c1, %c0_8, %c0_9] : memref<3x16x32xf32, #tpu.memory_space<vmem>>, vector<1x16x32xf32>
    %14 = vector.shape_cast %13 : vector<1x16x32xf32> to vector<16x32xf32>
    %cst_10 = arith.constant dense<0.000000e+00> : vector<4x32xf32>
    %15 = tpu.matmul %0, %14, %cst_10 {dimension_numbers = #tpu.dot_dimension_numbers<[1], [0], [0], [1], [0, 0, 1, 1], [], []>} : vector<4x16xf32>, vector<16x32xf32>, vector<4x32xf32> -> vector<4x32xf32>
    %c1_11 = arith.constant 1 : index
    %c0_12 = arith.constant 0 : index
    %c0_13 = arith.constant 0 : index
    %16 = vector.load %arg2[%c1_11, %c0_12, %c0_13] : memref<3x1x32xf32, #tpu.memory_space<vmem>>, vector<1x1x32xf32>
    %17 = vector.shape_cast %16 : vector<1x1x32xf32> to vector<1x32xf32>
    %18 = vector.broadcast %17 : vector<1x32xf32> to vector<4x32xf32>
    %19 = arith.addf %15, %18 : vector<4x32xf32>
    %20 = math.tanh %19 : vector<4x32xf32>
    %c2 = arith.constant 2 : index
    %c0_14 = arith.constant 0 : index
    %c0_15 = arith.constant 0 : index
    %21 = vector.load %arg1[%c2, %c0_14, %c0_15] : memref<3x16x32xf32, #tpu.memory_space<vmem>>, vector<1x16x32xf32>
    %22 = vector.shape_cast %21 : vector<1x16x32xf32> to vector<16x32xf32>
    %cst_16 = arith.constant dense<0.000000e+00> : vector<4x32xf32>
    %23 = tpu.matmul %0, %22, %cst_16 {dimension_numbers = #tpu.dot_dimension_numbers<[1], [0], [0], [1], [0, 0, 1, 1], [], []>} : vector<4x16xf32>, vector<16x32xf32>, vector<4x32xf32> -> vector<4x32xf32>
    %c2_17 = arith.constant 2 : index
    %c0_18 = arith.constant 0 : index
    %c0_19 = arith.constant 0 : index
    %24 = vector.load %arg2[%c2_17, %c0_18, %c0_19] : memref<3x1x32xf32, #tpu.memory_space<vmem>>, vector<1x1x32xf32>
    %25 = vector.shape_cast %24 : vector<1x1x32xf32> to vector<1x32xf32>
    %26 = vector.broadcast %25 : vector<1x32xf32> to vector<4x32xf32>
    %27 = arith.addf %23, %26 : vector<4x32xf32>
    %28 = arith.negf %27 : vector<4x32xf32>
    %29 = math.exp %28 : vector<4x32xf32>
    %cst_20 = arith.constant 1.000000e+00 : f32
    %30 = vector.broadcast %cst_20 : f32 to vector<4x32xf32>
    %31 = arith.addf %30, %29 : vector<4x32xf32>
    %32 = arith.divf %30, %31 : vector<4x32xf32>
    %33 = arith.mulf %12, %20 : vector<4x32xf32>
    %34 = math.tanh %33 : vector<4x32xf32>
    %35 = arith.mulf %32, %34 : vector<4x32xf32>
    %c0_21 = arith.constant 0 : index
    %c0_22 = arith.constant 0 : index
    %c0_23 = arith.constant 0 : index
    %36 = vector.load %arg3[%c0_21, %c0_22, %c0_23] : memref<3x32x32xf32, #tpu.memory_space<vmem>>, vector<1x32x32xf32>
    %37 = vector.shape_cast %36 : vector<1x32x32xf32> to vector<32x32xf32>
    %cst_24 = arith.constant dense<0.000000e+00> : vector<4x32xf32>
    %38 = tpu.matmul %35, %37, %cst_24 {dimension_numbers = #tpu.dot_dimension_numbers<[1], [0], [0], [1], [0, 0, 1, 1], [], []>} : vector<4x32xf32>, vector<32x32xf32>, vector<4x32xf32> -> vector<4x32xf32>
    %c0_25 = arith.constant 0 : index
    %c0_26 = arith.constant 0 : index
    %c0_27 = arith.constant 0 : index
    %39 = vector.load %arg4[%c0_25, %c0_26, %c0_27] : memref<3x1x32xf32, #tpu.memory_space<vmem>>, vector<1x1x32xf32>
    %40 = vector.shape_cast %39 : vector<1x1x32xf32> to vector<1x32xf32>
    %41 = vector.broadcast %40 : vector<1x32xf32> to vector<4x32xf32>
    %42 = arith.addf %38, %41 : vector<4x32xf32>
    %43 = arith.negf %42 : vector<4x32xf32>
    %44 = math.exp %43 : vector<4x32xf32>
    %cst_28 = arith.constant 1.000000e+00 : f32
    %45 = vector.broadcast %cst_28 : f32 to vector<4x32xf32>
    %46 = arith.addf %45, %44 : vector<4x32xf32>
    %47 = arith.divf %45, %46 : vector<4x32xf32>
    %c1_29 = arith.constant 1 : index
    %c0_30 = arith.constant 0 : index
    %c0_31 = arith.constant 0 : index
    %48 = vector.load %arg3[%c1_29, %c0_30, %c0_31] : memref<3x32x32xf32, #tpu.memory_space<vmem>>, vector<1x32x32xf32>
    %49 = vector.shape_cast %48 : vector<1x32x32xf32> to vector<32x32xf32>
    %cst_32 = arith.constant dense<0.000000e+00> : vector<4x32xf32>
    %50 = tpu.matmul %35, %49, %cst_32 {dimension_numbers = #tpu.dot_dimension_numbers<[1], [0], [0], [1], [0, 0, 1, 1], [], []>} : vector<4x32xf32>, vector<32x32xf32>, vector<4x32xf32> -> vector<4x32xf32>
    %c1_33 = arith.constant 1 : index
    %c0_34 = arith.constant 0 : index
    %c0_35 = arith.constant 0 : index
    %51 = vector.load %arg4[%c1_33, %c0_34, %c0_35] : memref<3x1x32xf32, #tpu.memory_space<vmem>>, vector<1x1x32xf32>
    %52 = vector.shape_cast %51 : vector<1x1x32xf32> to vector<1x32xf32>
    %53 = vector.broadcast %52 : vector<1x32xf32> to vector<4x32xf32>
    %54 = arith.addf %50, %53 : vector<4x32xf32>
    %55 = math.tanh %54 : vector<4x32xf32>
    %c2_36 = arith.constant 2 : index
    %c0_37 = arith.constant 0 : index
    %c0_38 = arith.constant 0 : index
    %56 = vector.load %arg3[%c2_36, %c0_37, %c0_38] : memref<3x32x32xf32, #tpu.memory_space<vmem>>, vector<1x32x32xf32>
    %57 = vector.shape_cast %56 : vector<1x32x32xf32> to vector<32x32xf32>
    %cst_39 = arith.constant dense<0.000000e+00> : vector<4x32xf32>
    %58 = tpu.matmul %35, %57, %cst_39 {dimension_numbers = #tpu.dot_dimension_numbers<[1], [0], [0], [1], [0, 0, 1, 1], [], []>} : vector<4x32xf32>, vector<32x32xf32>, vector<4x32xf32> -> vector<4x32xf32>
    %c2_40 = arith.constant 2 : index
    %c0_41 = arith.constant 0 : index
    %c0_42 = arith.constant 0 : index
    %59 = vector.load %arg4[%c2_40, %c0_41, %c0_42] : memref<3x1x32xf32, #tpu.memory_space<vmem>>, vector<1x1x32xf32>
    %60 = vector.shape_cast %59 : vector<1x1x32xf32> to vector<1x32xf32>
    %61 = vector.broadcast %60 : vector<1x32xf32> to vector<4x32xf32>
    %62 = arith.addf %58, %61 : vector<4x32xf32>
    %63 = arith.negf %62 : vector<4x32xf32>
    %64 = math.exp %63 : vector<4x32xf32>
    %cst_43 = arith.constant 1.000000e+00 : f32
    %65 = vector.broadcast %cst_43 : f32 to vector<4x32xf32>
    %66 = arith.addf %65, %64 : vector<4x32xf32>
    %67 = arith.divf %65, %66 : vector<4x32xf32>
    %68 = arith.mulf %47, %55 : vector<4x32xf32>
    %69 = math.tanh %68 : vector<4x32xf32>
    %70 = arith.mulf %67, %69 : vector<4x32xf32>
    %c0_44 = arith.constant 0 : index
    %c0_45 = arith.constant 0 : index
    %71 = vector.load %arg5[%c0_44, %c0_45] : memref<32x32xf32, #tpu.memory_space<vmem>>, vector<32x32xf32>
    %cst_46 = arith.constant dense<0.000000e+00> : vector<4x32xf32>
    %72 = tpu.matmul %70, %71, %cst_46 {dimension_numbers = #tpu.dot_dimension_numbers<[1], [0], [0], [1], [0, 0, 1, 1], [], []>} : vector<4x32xf32>, vector<32x32xf32>, vector<4x32xf32> -> vector<4x32xf32>
    %c0_47 = arith.constant 0 : index
    %c0_48 = arith.constant 0 : index
    %73 = vector.load %arg6[%c0_47, %c0_48] : memref<1x32xf32, #tpu.memory_space<vmem>>, vector<1x32xf32>
    %74 = vector.broadcast %73 : vector<1x32xf32> to vector<4x32xf32>
    %75 = arith.addf %72, %74 : vector<4x32xf32>
    %c0_49 = arith.constant 0 : index
    %c0_50 = arith.constant 0 : index
    %76 = vector.load %arg7[%c0_49, %c0_50] : memref<4x32xf32, #tpu.memory_space<vmem>>, vector<4x32xf32>
    tpu.vector_store %arg7[%c0_49, %c0_50], %75 {strides = array<i32>} : memref<4x32xf32, #tpu.memory_space<vmem>>, vector<4x32xf32>,
    return
  }
}

</mosaic_0001>

<bundles_post_ra>
// kernel: lstm_encoder_forward.1
= control target key start
LH: loop header
LB: loop body
LE: loop exit
PB: predicated region body
PF: predicated region fallthrough
CT: control target
= control target key end

     0   :  { %12 = vsyncpa [#allocation3], 0  ;;  %s745_s0 = inlined_call_operand.vmem [shape: f32[4,16], index: 0, kind: input, shape index: {}]   ;;  %s746_s1 = inlined_call_operand.hbm [shape: f32[3,16,32], index: 1, kind: input, shape index: {}]   ;;  %s747_s2 = inlined_call_operand.hbm [shape: f32[3,1,32], index: 2, kind: input, shape index: {}]   ;;  %s748_s3 = inlined_call_operand.hbm [shape: f32[3,32,32], index: 3, kind: input, shape index: {}]   ;;  %s749_s4 = inlined_call_operand.hbm [shape: f32[3,1,32], index: 4, kind: input, shape index: {}]   ;;  %s750_s5 = inlined_call_operand.hbm [shape: f32[32,32], index: 5, kind: input, shape index: {}]   ;;  %s751_s6 = inlined_call_operand.hbm [shape: f32[1,32], index: 6, kind: input, shape index: {}]   ;;  %s752_s7 = inlined_call_operand.hbm [shape: f32[4,32], index: 7, kind: output, shape index: {}]  }
   0x1   :  { %13 = vsyncpa [#allocation6], 0 }
   0x2   :  { %14 = vsyncpa [#allocation9], 0 }
   0x3   :  { %15 = vsyncpa [#allocation12], 0  ;;  %s36_s26 = sshll.u32 %s747_s2, 4  ;;  %s37_s26 = int_to_ptr.hbm [resolvable:$true] %s36_s26 }
   0x4   :  { %16 = vsyncpa [#allocation4], 0  ;;  %s666_s27 = smov [#allocation5]   ;;  %s62_s8 = sshll.u32 %s749_s4, 4  ;;  %s63_s8 = int_to_ptr.hbm [resolvable:$true] %s62_s8 }
   0x5   :  { %s38_s28 = sshll.u32 %s666_s27, 4  ;;  %s667_s9 = smov 16   ;;  %s39_s28 = int_to_ptr.vmem [resolvable:$true] %s38_s28 }
   0x6   :  { %s668_s10 = smov 1   ;;  %s669_s11 = smov [#allocation8]  }
   0x7   :  { %44 = dma.hbm_to_vmem [thread:$0]  %s37_s26, 48, %s39_s28, [#allocation6], %s667_s9, %s667_s9, %s668_s10  }
   0x8   :  { %s64_s12 = sshll.u32 %s669_s11, 4  ;;  %s23_s15 = sshll.u32 %s746_s1, 4  ;;  %s65_s12 = int_to_ptr.vmem [resolvable:$true] %s64_s12  ;;  %s24_s15 = int_to_ptr.hbm [resolvable:$true] %s23_s15 }
   0x9   :  { %70 = dma.hbm_to_vmem [thread:$0]  %s63_s8, 48, %s65_s12, [#allocation9], %s667_s9, %s667_s9, %s668_s10  }
   0xa   :  { %s670_s2 = smov [#allocation2]   ;;  %s49_s4 = sshll.u32 %s748_s3, 4  ;;  %s50_s4 = int_to_ptr.hbm [resolvable:$true] %s49_s4 }
   0xb   :  { %s25_s16 = sshll.u32 %s670_s2, 4  ;;  %s671_s19 = smov 128   ;;  %s26_s16 = int_to_ptr.vmem [resolvable:$true] %s25_s16 }
   0xc   :  { %s672_s20 = smov 8   ;;  %s673_s21 = smov [#allocation7]  }
   0xd   :  { %31 = dma.hbm_to_vmem [thread:$0]  %s24_s15, 768, %s26_s16, [#allocation3], %s671_s19, %s671_s19, %s672_s20  }
   0xe   :  { %s51_s22 = sshll.u32 %s673_s21, 4  ;;  %s75_s1 = sshll.u32 %s750_s5, 4  ;;  %s52_s22 = int_to_ptr.vmem [resolvable:$true] %s51_s22  ;;  %s76_s1 = int_to_ptr.hbm [resolvable:$true] %s75_s1 }
   0xf   :  { %57 = dma.hbm_to_vmem [thread:$0]  %s50_s4, 1536, %s52_s22, [#allocation6], %s671_s19, %s671_s19, %s672_s20  }
  0x10   :  { %s89_s27 = sshll.u32 %s751_s6, 4  ;;  %s674_s28 = smov [#allocation10]   ;;  %s90_s27 = int_to_ptr.hbm [resolvable:$true] %s89_s27 }
  0x11   :  { %s77_s29 = sshll.u32 %s674_s28, 4  ;;  %s675_s3 = smov [#allocation11]   ;;  %s78_s29 = int_to_ptr.vmem [resolvable:$true] %s77_s29 }
  0x12   :  { %83 = dma.hbm_to_vmem [thread:$0]  %s76_s1, 512, %s78_s29, [#allocation9], %s671_s19, %s671_s19, %s672_s20  }
  0x13   :  { %s91_s30 = sshll.u32 %s675_s3, 4  ;;  %s92_s30 = int_to_ptr.vmem [resolvable:$true] %s91_s30 }
  0x14   :  { %94 = dma.hbm_to_vmem [thread:$0]  %s90_s27, 16, %s92_s30, [#allocation12]  }
  0x15   :  { %656 = dma.done.wait [#allocation3], 768  }
  0x16   :  { %657 = vsyncadd [#allocation3], 4294966528 }
  0x17   :  { %658 = dma.done.wait [#allocation6], 1584  }
  0x18   :  { %659 = vsyncadd [#allocation6], 4294965712 }
  0x19   :  { %660 = dma.done.wait [#allocation9], 560  }
  0x1a   :  { %661 = vsyncadd [#allocation9], 4294966736 }
  0x1b   :  { %662 = dma.done.wait [#allocation12], 16  }
  0x1c   :  { %663 = vsyncadd [#allocation12], 4294967280  ;;  %v121_v0 = vld [vmem:[#allocation2 + $0x8] sm:$0xff]  ;;  %v120_v2 = vld [vmem:[#allocation2] sm:$0xff]  ;;  %vm126_vm0 = vcmask 130048   ;;  %vm256_vm9 = vcmask 261120  }
  0x1d   :  { %v200_v1 = vld [vmem:[#allocation2 + $0x28] sm:$0xff]  ;;  %144 = vmatpush.msra.mxu0 %v121_v0  ;;  %v199_v3 = vld [vmem:[#allocation2 + $0x20] sm:$0xff]  ;;  %v171_v5 = vld [vmem:[#allocation2 + $0x18] sm:$0xff]  ;;  %s422_s11 = sshll.u32 %s752_s7, 4  ;;  %s423_s11 = int_to_ptr.hbm [resolvable:$true] %s422_s11 }
  0x1e   :  { %220 = vmatpush.msra.mxu2 %v200_v1  ;;  %v119_v4 = vld [vmem:[%s745_s0] sm:$0xf]  ;;  %191 = vmatpush.msra.mxu1 %v171_v5  ;;  %v170_v6 = vld [vmem:[#allocation2 + $0x10] sm:$0xff]  ;;  %v250_v13 = vld [vmem:[#allocation7 + $0x10] sm:$0xff]  ;;  %s676_s0 = smov [#allocation13]  }
  0x1f   :  { %145 = vmatpush.msra.mxu0 %v120_v2  ;;  %v457_v7 = vld [vmem:[#allocation5] ss:$0 sm:$0xff]  ;;  %v302_v14 = vld [vmem:[#allocation7 + $0x30] sm:$0xff]  ;;  %v458_v17 = vld [vmem:[#allocation5 + $0x2] ss:$0 sm:$0xff]  ;;  %s420_s8 = sshll.u32 %s676_s0, 4  ;;  %s421_s8 = int_to_ptr.vmem [resolvable:$true] %s420_s8 }
  0x20   :  { %221 = vmatpush.msra.mxu2 %v199_v3  ;;  %435 = vmatmul.msk.f32.vlgmr.msra.gmra.mxu0 %vm126_vm0, %v119_v4  ;;  %v251_v10 = vld [vmem:[#allocation7 + $0x18] sm:$0xff]  ;;  %v333_v15 = vld [vmem:[#allocation7 + $0x50] sm:$0xff]  ;;  %v249_v18 = vld [vmem:[#allocation7 + $0x8] sm:$0xff] }
  0x21   :  { %438 = vmatmul.msk.f32.vlgmr.msra.gmra.mxu2 %vm126_vm0, %v119_v4  ;;  %192 = vmatpush.msra.mxu1 %v170_v6  ;;  %v303_v11 = vld [vmem:[#allocation7 + $0x38] sm:$0xff]  ;;  %v301_v19 = vld [vmem:[#allocation7 + $0x28] sm:$0xff]  ;;  %v248_v21 = vld [vmem:[#allocation7] sm:$0xff] }
  0x22   :  { %437 = vmatmul.msk.f32.vlgmr.msra.gmra.mxu1 %vm126_vm0, %v119_v4  ;;  %v334_v12 = vld [vmem:[#allocation7 + $0x58] sm:$0xff]  ;;  %272 = vmatpush.msra.mxu3 %v251_v10  ;;  %v332_v20 = vld [vmem:[#allocation7 + $0x48] sm:$0xff]  ;;  %v300_v22 = vld [vmem:[#allocation7 + $0x20] sm:$0xff] }
  0x23   :  { %321 = vmatpush.msrb.mxu0 %v303_v11  ;;  %352 = vmatpush.msrb.mxu1 %v334_v12  ;;  %v331_v24 = vld [vmem:[#allocation7 + $0x40] sm:$0xff]  ;;  %v459_v29 = vld [vmem:[#allocation5 + $0x1] ss:$0 sm:$0xff]  ;;  %v384_v61 = vld [vmem:[#allocation10 + $0x10] sm:$0xff] }
  0x24   :  { %273 = vmatpush.msra.mxu3 %v250_v13  ;;  %v461_v58 = vld [vmem:[#allocation8 + $0x2] ss:$0 sm:$0xff]  ;;  %v462_v63 = vld [vmem:[#allocation8] ss:$0 sm:$0xff]  ;;  %v383_v0 = vld [vmem:[#allocation10 + $0x8] sm:$0xff] }
  0x25   :  { %322 = vmatpush.msrb.mxu0 %v302_v14  ;;  %353 = vmatpush.msrb.mxu1 %v333_v15  ;;  %v385_v60 = vld [vmem:[#allocation10 + $0x18] sm:$0xff]  ;;  %v382_v2 = vld [vmem:[#allocation10] sm:$0xff] }
  0x26   :  { %274 = vmatpush.msra.mxu3 %v249_v18  ;;  %405 = vmatpush.msrb.mxu2 %v385_v60  ;;  %v460_v10 = vld [vmem:[#allocation8 + $0x1] ss:$0 sm:$0xff] }
  0x27   :  { %323 = vmatpush.msrb.mxu0 %v301_v19  ;;  %354 = vmatpush.msrb.mxu1 %v332_v20 }
  0x28   :  { %275 = vmatpush.msra.mxu3 %v248_v21  ;;  %406 = vmatpush.msrb.mxu2 %v384_v61 }
  0x29   :  { %324 = vmatpush.msrb.mxu0 %v300_v22  ;;  %355 = vmatpush.msrb.mxu1 %v331_v24 }
  0x2a   :  { %407 = vmatpush.msrb.mxu2 %v383_v0 }
  0x2c   :  { %408 = vmatpush.msrb.mxu2 %v382_v2 }
  0x9d   :  { %v147_v8 = vpop.f32.mrf.mxu0 }
  0x9e   :  { %v148_v9 = vadd.f32 %v457_v7, %v147_v8 }
  0x9f   :  { %v194_v30 = vpop.f32.mrf.mxu1 }
  0xa0   :  { %v436_v16 = vmul.f32 -1.442695, %v148_v9  ;;  %v195_v33 = vadd.f32 %v459_v29, %v194_v30 }
  0xa2   :  { %464 = vpow2.f32 %v436_v16 }
  0xa4   :  { %v223_v23 = vpop.f32.mrf.mxu2 }
  0xa5   :  { %v224_v25 = vadd.f32 %v458_v17, %v223_v23 }
  0xa7   :  { %v439_v26 = vmul.f32 -1.442695, %v224_v25 }
  0xa8   :  { %v465_v27 = vpop.eup %464 }
  0xa9   :  { %466 = vpow2.f32 %v439_v26  ;;  %v153_v28 = vadd.f32 1.0, %v465_v27 }
  0xab   :  { %468 = vrcp.f32 %v153_v28  ;;  %v165_v37 = vand.u32 2147483648, %v153_v28  ;;  %v163_v39 = vand.u32 2147483647, %v153_v28  ;;  %vm159_vm2 = vweird.f32 %v153_v28 }
  0xad   :  { %v166_v44 = vor.u32 1.1754944e-38, %v165_v37  ;;  %vm164_vm4 = vcmp.eq.f32.partialorder %v163_v39, 8.507059e+37  ;;  %v463_v37 = vld [vmem:[#allocation11] ss:$0 sm:$0xff] }
  0xaf   :  { %v467_v31 = vpop.eup %466 }
  0xb0   :  { %v229_v32 = vadd.f32 1.0, %v467_v31 }
  0xb1   :  { %v469_v34 = vpop.eup %468 }
  0xb2   :  { %470 = vrcp.f32 %v229_v32  ;;  %v155_v35 = vmul.f32 %v469_v34, %v153_v28  ;;  %vm160_vm1 = vweird.f32 %v469_v34  ;;  %v241_v51 = vand.u32 2147483648, %v229_v32 }
  0xb3   :  { %472 = vtanh.f32 %v195_v33  ;;  %vm161_vm3 = vmor %vm159_vm2, %vm160_vm1  ;;  %vm235_vm6 = vweird.f32 %v229_v32  ;;  %v239_v52 = vand.u32 2147483647, %v229_v32  ;;  %vm413_vm2 = vcmask 257024  }
  0xb4   :  { %v156_v36 = vsub.f32 1.0, %v155_v35  ;;  %v242_v54 = vor.u32 1.1754944e-38, %v241_v51 }
  0xb5   :  { %vm240_vm8 = vcmp.eq.f32.partialorder %v239_v52, 8.507059e+37 }
  0xb6   :  { %v157_v38 = vmul.f32 %v469_v34, %v156_v36 }
  0xb8   :  { %v471_v40 = vpop.eup %470  ;;  %v158_v42 = vadd.f32 %v469_v34, %v157_v38 }
  0xb9   :  { %v231_v41 = vmul.f32 %v471_v40, %v229_v32  ;;  %v473_v43 = vpop.eup %472  ;;  %vm236_vm5 = vweird.f32 %v471_v40 }
  0xba   :  { %v162_v45 = vsel %vm161_vm3, %v469_v34, %v158_v42  ;;  %vm237_vm7 = vmor %vm235_vm6, %vm236_vm5 }
  0xbb   :  { %v232_v46 = vsub.f32 1.0, %v231_v41  ;;  %v167_v47 = vsel %vm164_vm4, %v166_v44, %v162_v45 }
  0xbc   :  { %v245_v48 = vmul.f32 %v473_v43, %v167_v47 }
  0xbd   :  { %v233_v49 = vmul.f32 %v471_v40, %v232_v46 }
  0xbe   :  { %474 = vtanh.f32 %v245_v48 }
  0xbf   :  { %v234_v50 = vadd.f32 %v471_v40, %v233_v49 }
  0xc1   :  { %v238_v53 = vsel %vm237_vm7, %v471_v40, %v234_v50 }
  0xc2   :  { %v243_v56 = vsel %vm240_vm8, %v242_v54, %v238_v53 }
  0xc4   :  { %v475_v55 = vpop.eup %474 }
  0xc5   :  { %v247_v57 = vmul.f32 %v475_v55, %v243_v56 }
  0xc7   :  { %440 = vmatmul.msk.f32.vlgmr.msra.gmra.mxu3 %vm256_vm9, %v247_v57  ;;  %442 = vmatmul.msk.f32.vlgmr.msrb.gmra.mxu0 %vm256_vm9, %v247_v57 }
  0xc8   :  { %443 = vmatmul.msk.f32.vlgmr.msrb.gmra.mxu1 %vm256_vm9, %v247_v57 }
 0x144   :  { %v326_v12 = vpop.f32.mrf.mxu0 }
 0x145   :  { %v357_v59 = vpop.f32.mrf.mxu1  ;;  %v327_v14 = vadd.f32 %v460_v10, %v326_v12 }
 0x146   :  { %v358_v62 = vadd.f32 %v461_v58, %v357_v59 }
 0x148   :  { %v444_v1 = vmul.f32 -1.442695, %v358_v62 }
 0x14a   :  { %476 = vpow2.f32 %v444_v1  ;;  %v277_v3 = vpop.f32.mrf.mxu3 }
 0x14b   :  { %v278_v4 = vadd.f32 %v462_v63, %v277_v3 }
 0x14d   :  { %v441_v5 = vmul.f32 -1.442695, %v278_v4 }
 0x14f   :  { %478 = vpow2.f32 %v441_v5 }
 0x150   :  { %v477_v6 = vpop.eup %476 }
 0x151   :  { %v363_v7 = vadd.f32 1.0, %v477_v6 }
 0x153   :  { %480 = vrcp.f32 %v363_v7  ;;  %v375_v30 = vand.u32 2147483648, %v363_v7  ;;  %vm369_vm15 = vweird.f32 %v363_v7  ;;  %v373_v31 = vand.u32 2147483647, %v363_v7 }
 0x155   :  { %v479_v8 = vpop.eup %478  ;;  %v376_v33 = vor.u32 1.1754944e-38, %v375_v30  ;;  %vm374_vm1 = vcmp.eq.f32.partialorder %v373_v31, 8.507059e+37 }
 0x156   :  { %v283_v9 = vadd.f32 1.0, %v479_v8 }
 0x158   :  { %482 = vrcp.f32 %v283_v9  ;;  %v295_v19 = vand.u32 2147483648, %v283_v9  ;;  %v293_v21 = vand.u32 2147483647, %v283_v9  ;;  %vm289_vm11 = vweird.f32 %v283_v9 }
 0x159   :  { %v481_v11 = vpop.eup %480  ;;  %484 = vtanh.f32 %v327_v14 }
 0x15a   :  { %v365_v15 = vmul.f32 %v481_v11, %v363_v7  ;;  %v296_v23 = vor.u32 1.1754944e-38, %v295_v19  ;;  %vm294_vm13 = vcmp.eq.f32.partialorder %v293_v21, 8.507059e+37  ;;  %vm370_vm14 = vweird.f32 %v481_v11 }
 0x15b   :  { %vm371_vm0 = vmor %vm369_vm15, %vm370_vm14 }
 0x15c   :  { %v366_v18 = vsub.f32 1.0, %v365_v15 }
 0x15e   :  { %v483_v13 = vpop.eup %482  ;;  %v367_v24 = vmul.f32 %v481_v11, %v366_v18 }
 0x15f   :  { %v285_v16 = vmul.f32 %v483_v13, %v283_v9  ;;  %vm290_vm10 = vweird.f32 %v483_v13  ;;  %v485_v26 = vpop.eup %484 }
 0x160   :  { %vm291_vm12 = vmor %vm289_vm11, %vm290_vm10  ;;  %v368_v29 = vadd.f32 %v481_v11, %v367_v24 }
 0x161   :  { %v286_v17 = vsub.f32 1.0, %v285_v16 }
 0x162   :  { %v372_v32 = vsel %vm371_vm0, %v481_v11, %v368_v29 }
 0x163   :  { %v287_v20 = vmul.f32 %v483_v13, %v286_v17  ;;  %v377_v35 = vsel %vm374_vm1, %v376_v33, %v372_v32 }
 0x165   :  { %v288_v22 = vadd.f32 %v483_v13, %v287_v20 }
 0x167   :  { %v292_v25 = vsel %vm291_vm12, %v483_v13, %v288_v22 }
 0x168   :  { %v297_v27 = vsel %vm294_vm13, %v296_v23, %v292_v25 }
 0x169   :  { %v379_v28 = vmul.f32 %v485_v26, %v297_v27 }
 0x16b   :  { %486 = vtanh.f32 %v379_v28 }
 0x171   :  { %v487_v34 = vpop.eup %486 }
 0x172   :  { %v381_v36 = vmul.f32 %v487_v34, %v377_v35 }
 0x174   :  { %445 = vmatmul.msk.f32.vlgmr.msrb.gmra.mxu2 %vm256_vm9, %v381_v36 }
 0x1f7   :  { %v410_v38 = vpop.f32.mrf.mxu2 }
 0x1f8   :  { %v411_v39 = vadd.f32 %v463_v37, %v410_v38 }
 0x1fa   :  { %414 = vst.msk [vmem:[#allocation13] sm:$0xf] %vm413_vm2, %v411_v39 }
 0x1fb   :  { %425 = dma.vmem_to_hbm [thread:$0]  %s421_s8, 64, %s423_s11, [#allocation4]  }
 0x1fc   :  { %664 = dma.done.wait [#allocation4], 64  }
 0x1fd   :  { %665 = vsyncadd [#allocation4], 4294967232 }
 0x1fe   :  { %430 = vsyncpa [#allocation3], 1 }
 0x1ff   :  { %431 = vsyncpa [#allocation6], 1 }
 0x200   :  { %432 = vsyncpa [#allocation9], 1 }
 0x201   :  { %433 = vsyncpa [#allocation12], 1 }
 0x202   :  { %434 = vsyncpa [#allocation4], 1 }

</bundles_post_ra>
